<compile_context>
chip_gen: v7x
topology: tpu7x:2x2x1
jax: 0.10.0
libtpu: 0.0.40
codegen_flags: <defaults>
</compile_context>

<pallas_src>
import functools

import jax
import jax.numpy as jnp
from jax.experimental import pallas as pl
from jax.experimental.pallas import tpu as pltpu


# ---------------------------------------------------------------------------
# Kernel
# ---------------------------------------------------------------------------
def conv1d_wn_kernel(x_ref, halo_ref, w_ref, b_ref, o_ref, *,
                     K, dilation, pad, fuse_taps):
    """One (batch, length-tile) grid step.

    x_ref:    (Cin, TL)          main input tile (NCL slice, no halo)
    halo_ref: (Cin, 2*pad)       [left halo | right halo] boundary columns
    w_ref:    (Cout, K*Cin)      if fuse_taps else (K, Cout, Cin)
    b_ref:    (Cout, 1)          bias (f32)
    o_ref:    (Cout, TL)         output tile (L on the lane axis)
    """
    TL = o_ref.shape[-1]
    x = x_ref[...]
    if pad > 0:
        # Stitch the (K-1)*dilation halo onto the tile: (Cin, TL + 2*pad).
        xh = jnp.concatenate(
            [halo_ref[:, :pad], x, halo_ref[:, pad:2 * pad]], axis=-1)
    else:
        xh = x

    if fuse_taps:
        # Shallow Cin: fuse all taps into one MXU contraction of depth K*Cin.
        xk = jnp.concatenate(
            [xh[:, k * dilation:k * dilation + TL] for k in range(K)], axis=0)
        acc = jnp.dot(w_ref[...], xk, preferred_element_type=jnp.float32)
    else:
        # Deep Cin: K accumulating dots, no (K*Cin, TL) VMEM concat.
        acc = jnp.dot(w_ref[0], xh[:, 0:TL],
                      preferred_element_type=jnp.float32)
        for k in range(1, K):
            acc = acc + jnp.dot(w_ref[k],
                                xh[:, k * dilation:k * dilation + TL],
                                preferred_element_type=jnp.float32)

    o_ref[...] = (acc + b_ref[...]).astype(o_ref.dtype)


# ---------------------------------------------------------------------------
# Tile selection helpers
# ---------------------------------------------------------------------------
def _tile_footprint(TL, *, Cin, Cout, K, pad, itemsize, fuse_taps):
    """Approximate per-step VMEM bytes (double-buffered blocks + temporaries)."""
    x_buf = 2 * Cin * TL * itemsize
    halo_buf = 2 * Cin * max(2 * pad, 1) * itemsize
    out_buf = 2 * Cout * TL * itemsize
    w_buf = 2 * K * Cin * Cout * itemsize
    b_buf = 2 * Cout * 4
    tmp = Cin * (TL + 2 * pad) * itemsize + Cout * TL * 4   # xh + f32 acc
    if fuse_taps:
        tmp += K * Cin * TL * itemsize                      # fused (K*Cin, TL)
    return x_buf + halo_buf + out_buf + w_buf + b_buf + tmp


def _pick_length_tile(L, B, *, budget, **fp_kw):
    """Largest lane-dense (multiple-of-128) tile fitting the VMEM budget."""
    if L <= 128:
        return L                      # full-dim block (allowed for small L)
    TL = 128
    for cand in (1024, 512, 256, 128):   # powers of two -> 256-friendly MXU N
        if cand <= max(L, 128) and _tile_footprint(cand, **fp_kw) <= budget:
            TL = cand
            break
    # v7x megacore: make sure there are at least 2 parallel grid steps.
    while B * (-(-L // TL)) < 2 and TL >= 256:
        TL //= 2
    return TL


# ---------------------------------------------------------------------------
# Forward wrapper
# ---------------------------------------------------------------------------
def conv_forward(x_ncl, weight_v, weight_g, bias, *, dilation=1):
    """Forward pass of `Conv` (weight-normalized Conv1d, same padding).

    x_ncl:    (B, Cin, L)      -- PyTorch NCL layout
    weight_v: (Cout, Cin, K)   -- weight_norm "v"
    weight_g: (Cout,)          -- weight_norm "g"
    bias:     (Cout,)
    returns:  (B, Cout, L)
    """
    B, Cin, L = x_ncl.shape
    Cout, Cin_w, K = weight_v.shape
    assert Cin_w == Cin
    assert K % 2 == 1, "same-padding Conv assumes odd kernel_size"
    pad = dilation * (K - 1) // 2
    dtype = x_ncl.dtype
    itemsize = jnp.dtype(dtype).itemsize

    # ---- weight norm, hoisted out of the kernel (single tiny XLA op) ----
    v32 = weight_v.astype(jnp.float32)
    inv_norm = jax.lax.rsqrt(jnp.sum(v32 * v32, axis=(1, 2), keepdims=True))
    w_norm = weight_g.astype(jnp.float32).reshape(Cout, 1, 1) * v32 * inv_norm

    fuse_taps = Cin < 128
    if fuse_taps:
        # (Cout, K*Cin) tap-major columns: cols [k*Cin:(k+1)*Cin] == w[:, :, k]
        w_arg = jnp.transpose(w_norm, (0, 2, 1)).reshape(Cout, K * Cin)
        w_arg = w_arg.astype(dtype)
        w_spec = pl.BlockSpec((Cout, K * Cin), lambda b, j: (0, 0))
        # TODO(synk): pad K*Cin columns to a 256 multiple once MXU-bound.
    else:
        w_arg = jnp.transpose(w_norm, (2, 0, 1)).astype(dtype)   # (K, Cout, Cin)
        w_spec = pl.BlockSpec((K, Cout, Cin), lambda b, j: (0, 0, 0))
    b_2d = bias.astype(jnp.float32).reshape(Cout, 1)

    # ---- generation-aware VMEM budget ----
    try:
        vmem_cap = int(pltpu.get_tpu_info().vmem_capacity_bytes)
    except Exception:
        vmem_cap = 64 * 1024 * 1024
    vmem_limit = int(min(64 * 1024 * 1024, max(32 * 1024 * 1024, vmem_cap // 2)))

    TL = _pick_length_tile(
        L, B, budget=int(0.7 * vmem_limit),
        Cin=Cin, Cout=Cout, K=K, pad=pad, itemsize=itemsize,
        fuse_taps=fuse_taps)
    n_tiles = -(-L // TL)
    Lp = n_tiles * TL
    x_main = x_ncl if Lp == L else jnp.pad(
        x_ncl, ((0, 0), (0, 0), (0, Lp - L)))    # only in the ragged-L case

    # ---- tiny per-tile halo side input: (B, n_tiles, Cin, 2*pad) ----
    if pad > 0:
        x_r = x_main.reshape(B, Cin, n_tiles, TL)
        zpad = jnp.zeros((B, Cin, 1, pad), dtype)
        lh = jnp.concatenate([zpad, x_r[:, :, :-1, TL - pad:]], axis=2)
        rh = jnp.concatenate([x_r[:, :, 1:, :pad], zpad], axis=2)
        halo = jnp.transpose(jnp.concatenate([lh, rh], axis=-1), (0, 2, 1, 3))
    else:
        halo = jnp.zeros((B, n_tiles, Cin, 1), dtype)   # dummy, unused
    halo_w = halo.shape[-1]

    kernel = functools.partial(conv1d_wn_kernel, K=K, dilation=dilation,
                               pad=pad, fuse_taps=fuse_taps)

    cost = pl.CostEstimate(
        flops=2 * B * L * Cout * Cin * K,
        transcendentals=0,
        bytes_accessed=((x_main.size + halo.size + w_arg.size) * itemsize
                        + b_2d.size * 4 + B * Cout * L * itemsize),
    )

    out = pl.pallas_call(
        kernel,
        out_shape=jax.ShapeDtypeStruct((B, Cout, L), dtype),
        grid=(B, n_tiles),
        in_specs=[
            pl.BlockSpec((pl.Squeezed(), Cin, TL), lambda b, j: (b, 0, j)),
            pl.BlockSpec((pl.Squeezed(), pl.Squeezed(), Cin, halo_w),
                         lambda b, j: (b, j, 0, 0)),
            w_spec,
            pl.BlockSpec((Cout, 1), lambda b, j: (0, 0)),
        ],
        out_specs=pl.BlockSpec((pl.Squeezed(), Cout, TL),
                               lambda b, j: (b, 0, j)),
        compiler_params=pltpu.CompilerParams(
            dimension_semantics=("parallel", "parallel"),
            vmem_limit_bytes=vmem_limit,
        ),
        cost_estimate=cost,
    )(x_main, halo, w_arg, b_2d)
    return out


# ---------------------------------------------------------------------------
# Pure-JAX reference (lax conv) for correctness checking
# ---------------------------------------------------------------------------
def reference_forward(x_ncl, weight_v, weight_g, bias, *, dilation=1):
    Cout, Cin, K = weight_v.shape
    pad = dilation * (K - 1) // 2
    norm = jnp.sqrt(jnp.sum(weight_v ** 2, axis=(1, 2), keepdims=True))
    w_eff = weight_g.reshape(Cout, 1, 1) * weight_v / norm
    out = jax.lax.conv_general_dilated(
        x_ncl, w_eff,
        window_strides=(1,),
        padding=[(pad, pad)],
        rhs_dilation=(dilation,),
        dimension_numbers=("NCH", "OIH", "NCH"),
    )
    return out + bias[None, :, None]


def _make_params(key, Cin, Cout, K):
    """Deterministic params mirroring the module's __init__ (weight_norm +
    kaiming-normal weight, default Conv1d bias init)."""
    k_v, k_b = jax.random.split(key)
    fan_in = Cin * K
    weight_v = jax.random.normal(k_v, (Cout, Cin, K), dtype=jnp.float32) \
        * jnp.sqrt(2.0 / fan_in)
    weight_g = jnp.sqrt(jnp.sum(weight_v ** 2, axis=(1, 2)))
    bound = 1.0 / jnp.sqrt(jnp.float32(fan_in))
    bias = jax.random.uniform(k_b, (Cout,), minval=-bound, maxval=bound,
                              dtype=jnp.float32)
    return weight_v, weight_g, bias


if __name__ == "__main__":
    key = jax.random.PRNGKey(0)

    # (B, Cin, Cout, L, K, dilation): tiny case + multi-tile case (halo path)
    # + deep-channel case (K accumulating-dot path).
    cases = [
        (2, 4, 8, 16, 3, 1),
        (1, 8, 16, 512, 3, 1),
        (1, 128, 128, 256, 3, 1),
    ]

    for idx, (B, Cin, Cout, L, K, dilation) in enumerate(cases):
        key, k_x, k_p = jax.random.split(key, 3)
        x = jax.random.normal(k_x, (B, Cin, L), dtype=jnp.float32)
        weight_v, weight_g, bias = _make_params(k_p, Cin, Cout, K)

        out = conv_forward(x, weight_v, weight_g, bias, dilation=dilation)
        out = jax.block_until_ready(out)

        ref = reference_forward(x, weight_v, weight_g, bias, dilation=dilation)
        assert out.shape == (B, Cout, L), (idx, out.shape)
        err = float(jnp.max(jnp.abs(out - ref)))
        assert jnp.allclose(out, ref, atol=2e-4, rtol=2e-4), (idx, err)

    print("KERNEL_OK")
</pallas_src>

<mosaic_0001>
module attributes {stable_mosaic.version = 11 : i64} {
  func.func @conv1d_wn_kernel(%arg0: i32, %arg1: i32, %arg2: memref<1x4x16xf32, #tpu.memory_space<vmem>>, %arg3: memref<1x1x4x2xf32, #tpu.memory_space<vmem>>, %arg4: memref<8x12xf32, #tpu.memory_space<vmem>>, %arg5: memref<8x1xf32, #tpu.memory_space<vmem>>, %arg6: memref<1x8x16xf32, #tpu.memory_space<vmem>>) attributes {dimension_semantics = [#tpu.dimension_semantics<parallel>, #tpu.dimension_semantics<parallel>], iteration_bounds = array<i64: 2, 1>, scalar_prefetch = 0 : i64, scratch_operands = 0 : i64, tpu.core_type = #tpu.core_type<tc>, window_params = [{transform_indices = @transform_0, window_bounds = array<i64: 1, 4, 16>}, {transform_indices = @transform_1, window_bounds = array<i64: 1, 1, 4, 2>}, {pipeline_mode = #tpu.pipeline_mode<synchronous>, transform_indices = @transform_2, window_bounds = array<i64: 8, 12>}, {pipeline_mode = #tpu.pipeline_mode<synchronous>, transform_indices = @transform_3, window_bounds = array<i64: 8, 1>}, {transform_indices = @transform_4, window_bounds = array<i64: 1, 8, 16>}]} {
    %c0 = arith.constant 0 : index
    %c0_0 = arith.constant 0 : index
    %c0_1 = arith.constant 0 : index
    %0 = vector.load %arg2[%c0, %c0_0, %c0_1] : memref<1x4x16xf32, #tpu.memory_space<vmem>>, vector<1x4x16xf32>
    %1 = vector.shape_cast %0 : vector<1x4x16xf32> to vector<4x16xf32>
    %c0_2 = arith.constant 0 : index
    %c0_3 = arith.constant 0 : index
    %c0_4 = arith.constant 0 : index
    %c0_5 = arith.constant 0 : index
    %2 = vector.load %arg3[%c0_2, %c0_3, %c0_4, %c0_5] : memref<1x1x4x2xf32, #tpu.memory_space<vmem>>, vector<1x1x4x1xf32>
    %3 = vector.shape_cast %2 : vector<1x1x4x1xf32> to vector<4x1xf32>
    %c0_6 = arith.constant 0 : index
    %c0_7 = arith.constant 0 : index
    %c0_8 = arith.constant 0 : index
    %c1 = arith.constant 1 : index
    %4 = vector.load %arg3[%c0_6, %c0_7, %c0_8, %c1] : memref<1x1x4x2xf32, #tpu.memory_space<vmem>>, vector<1x1x4x1xf32>
    %5 = vector.shape_cast %4 : vector<1x1x4x1xf32> to vector<4x1xf32>
    %6 = tpu.concatenate %3, %1, %5 in 1 : vector<4x1xf32>, vector<4x16xf32>, vector<4x1xf32> -> vector<4x18xf32>
    %7 = vector.extract_strided_slice %6 {offsets = [0, 0], sizes = [4, 16], strides = [1, 1]} : vector<4x18xf32> to vector<4x16xf32>
    %8 = vector.extract_strided_slice %6 {offsets = [0, 1], sizes = [4, 16], strides = [1, 1]} : vector<4x18xf32> to vector<4x16xf32>
    %9 = vector.extract_strided_slice %6 {offsets = [0, 2], sizes = [4, 16], strides = [1, 1]} : vector<4x18xf32> to vector<4x16xf32>
    %10 = tpu.concatenate %7, %8, %9 in 0 : vector<4x16xf32>, vector<4x16xf32>, vector<4x16xf32> -> vector<12x16xf32>
    %c0_9 = arith.constant 0 : index
    %c0_10 = arith.constant 0 : index
    %11 = vector.load %arg4[%c0_9, %c0_10] : memref<8x12xf32, #tpu.memory_space<vmem>>, vector<8x12xf32>
    %cst = arith.constant dense<0.000000e+00> : vector<8x16xf32>
    %12 = tpu.matmul %11, %10, %cst {dimension_numbers = #tpu.dot_dimension_numbers<[1], [0], [0], [1], [0, 0, 1, 1], [], []>} : vector<8x12xf32>, vector<12x16xf32>, vector<8x16xf32> -> vector<8x16xf32>
    %c0_11 = arith.constant 0 : index
    %c0_12 = arith.constant 0 : index
    %13 = vector.load %arg5[%c0_11, %c0_12] : memref<8x1xf32, #tpu.memory_space<vmem>>, vector<8x1xf32>
    %14 = vector.broadcast %13 : vector<8x1xf32> to vector<8x16xf32>
    %15 = arith.addf %12, %14 : vector<8x16xf32>
    %c0_13 = arith.constant 0 : index
    %c0_14 = arith.constant 0 : index
    %c0_15 = arith.constant 0 : index
    %16 = vector.load %arg6[%c0_13, %c0_14, %c0_15] : memref<1x8x16xf32, #tpu.memory_space<vmem>>, vector<1x8x16xf32>
    %17 = vector.shape_cast %16 : vector<1x8x16xf32> to vector<8x16xf32>
    %18 = vector.shape_cast %15 : vector<8x16xf32> to vector<1x8x16xf32>
    tpu.vector_store %arg6[%c0_13, %c0_14, %c0_15], %18 {strides = array<i32>} : memref<1x8x16xf32, #tpu.memory_space<vmem>>, vector<1x8x16xf32>,
    return
  }
  func.func @transform_0(%arg0: i32, %arg1: i32) -> (i32, i32, i32) {
    %c0_i32 = arith.constant 0 : i32
    %c0_i32_0 = arith.constant 0 : i32
    return %arg0, %c0_i32, %arg1 : i32, i32, i32
  }
  func.func @transform_1(%arg0: i32, %arg1: i32) -> (i32, i32, i32, i32) {
    %c0_i32 = arith.constant 0 : i32
    %c0_i32_0 = arith.constant 0 : i32
    %c0_i32_1 = arith.constant 0 : i32
    return %arg0, %arg1, %c0_i32, %c0_i32_0 : i32, i32, i32, i32
  }
  func.func @transform_2(%arg0: i32, %arg1: i32) -> (i32, i32) {
    %c0_i32 = arith.constant 0 : i32
    %c0_i32_0 = arith.constant 0 : i32
    %c0_i32_1 = arith.constant 0 : i32
    return %c0_i32, %c0_i32_0 : i32, i32
  }
  func.func @transform_3(%arg0: i32, %arg1: i32) -> (i32, i32) {
    %c0_i32 = arith.constant 0 : i32
    %c0_i32_0 = arith.constant 0 : i32
    %c0_i32_1 = arith.constant 0 : i32
    return %c0_i32, %c0_i32_0 : i32, i32
  }
  func.func @transform_4(%arg0: i32, %arg1: i32) -> (i32, i32, i32) {
    %c0_i32 = arith.constant 0 : i32
    %c0_i32_0 = arith.constant 0 : i32
    return %arg0, %c0_i32, %arg1 : i32, i32, i32
  }
}

</mosaic_0001>

<bundles_post_ra>
// kernel: tpu_custom_call.1
= control target key start
LH: loop header
LB: loop body
LE: loop exit
PB: predicated region body
PF: predicated region fallthrough
CT: control target
= control target key end

     0   :  { %9 = vsyncpa [#allocation3], 0  ;;  %s784_s0 = inlined_call_operand.vmem [shape: f32[2,4,16], index: 0, kind: input, shape index: {}]   ;;  %s785_s1 = inlined_call_operand.vmem [shape: f32[2,1,4,2], index: 1, kind: input, shape index: {}]   ;;  %s786_s2 = inlined_call_operand.vmem [shape: f32[8,12], index: 2, kind: input, shape index: {}]   ;;  %s787_s3 = inlined_call_operand.vmem [shape: f32[8,1], index: 3, kind: input, shape index: {}]   ;;  %s788_s4 = inlined_call_operand.hbm [shape: f32[2,8,16], index: 4, kind: output, shape index: {}]  }
   0x1   :  { %11 = vsyncpa [#allocation3 + $0x1], 0  ;;  %s663_s15 = smov 0   ;;  %s665_s16 = smov 0  }
   0x2   :  { %s667_s17 = smov 0   ;;  %s669_s18 = smov 0  }
   0x3   :  { %s671_s19 = smov 0   ;;  %s673_s20 = smov 0  }
   0x4 LB: > { %s455_s21 = sadd.s32 4294967295, %s626_s20   ;;  %s456_s22 = sadd.s32 4294967294, %s626_s20   ;;  %s626_s20 = sphi %s673_s20, %s17_s20   ;;  %s622_s19 = sphi %s671_s19, %s795_s19   ;;  %s618_s18 = sphi %s669_s18, %s794_s18   ;;  %s614_s17 = sphi %s667_s17, %s793_s17   ;;  %s610_s16 = sphi %s665_s16, %s792_s16   ;;  %s606_s15 = sphi %s663_s15, %s791_s15  }
   0x5   : > { %s29_s23 = sadd.s32 1, %s622_s19  ;;  %s136_s24 = sadd.s32 1, %s614_s17 }
   0x6   : > { %p31_p0 = scmp.ge.s32.totalorder %s29_s23, 2  ;;  %p146_p1 = scmp.ne.s32.totalorder %s614_s17, %s610_s16 }
   0x7   : > { %p147_p2 = scmp.eq.s32.totalorder %s455_s21, 1  ;;  %p152_p3 = scmp.ne.s32.totalorder %s610_s16, %s606_s15 }
   0x8   : > { %s797_s23 = smov (%p31_p0, %s29_s23), 0  ;;  %p153_p5 = scmp.eq.s32.totalorder %s456_s22, 1 }
   0x9   : > { %p703_p4 = por %p147_p2, %p146_p1  ;;  %s131_s26 = ssub.s32 %s622_s19, %s797_s23 }
   0xa   : > { %p459_p6 = scmp.ge.s32.totalorder %s626_s20, 1  ;;  %p134_p7 = scmp.eq.s32.totalorder %s131_s26, 0 }
   0xb   : > { %p710_p8 = por %p153_p5, %p152_p3  ;;  %p197_p9 = scmp.lt.s32.totalorder %s626_s20, 3 }
   0xc   : > { %s716_s28 = scalar_select %p134_p7, %s614_s17, %s136_s24  }
   0xd   : > { %p198_p10 = pnand %p459_p6, %p197_p9 }
   0xe   : > { %p232_p11 = scmp.lt.s32.totalorder (!%p198_p10), %s618_s18, 1  ;;  %s628_s11 = smov (!%p198_p10), 1   ;;  %v630_v3 = vmov (!%p198_p10), 0.0|0.0   ;;  %vm256_vm0 = vcmask (!%p198_p10), 7168   ;;  %vm258_vm1 = vcmask (!%p198_p10), 138240   ;;  %vm631_vm2 = vmmov (!%p198_p10), 0  }
   0xf   : > { %201 = sbr.rel (%p198_p10) target bundleno = 501 (0x1f5), region = 36  ;;  %s629_s12 = smov (!%p198_p10), 16   ;;  %479 = vmatprep.subr.bf16.mxu0 (!%p198_p10), %v630_v3  ;;  %v632_v4 = vmov (!%p198_p10), 0.0   ;;  %v270_v7 = vld [vmem:[%s787_s3] sm:$0xff] (!%p198_p10)  ;;  %v633_v9 = vmov (!%p198_p10), 0   ;;  %vm267_vm3 = vcmask (!%p198_p10), 1043456  }
  0x10   : > { %476 = vmatprep.mubr.msk.f32.mxu0 (!%p198_p10), %vm631_vm2, %v632_v4  ;;  %547 = vset.pattern.permute.xlu0 (!%p198_p10), %v633_v9  ;;  %s634_s21 = smov (!%p198_p10), 127   ;;  %s635_s22 = smov (!%p198_p10), 126   ;;  %vm636_vm4 = vmmov (!%p198_p10), 1   ;;  %v269_v15 = vld [vmem:[%s786_s2] sm:$0xff] (!%p198_p10)  ;;  %vm276_vm6 = vcmask (!%p198_p10), 97280   ;;  %vm352_vm7 = vcmask (!%p198_p10), 130048  }
  0x11   : > { %vm481_vm5 = vmpackc.low (!%p198_p10), %vm267_vm3, %vm636_vm4  ;;  %s466_s5 = sshll.u32 (!%p198_p10), %s618_s18, 7 }
  0x16   : > { %s233_s29 = scalar_select %p232_p11, %s618_s18, 1 }
  0x17   : > { %s637_s18 = smov [#allocation2]  }
  0x18   : > { %s461_s30 = sshll.u32 %s233_s29, 2  ;;  %s229_s29 = sand.u32 1, %s610_s16  }
  0x19   : > { %s238_s7 = scalar_lea.vmem %s784_s0, %s461_s30  ;;  %s245_s10 = scalar_lea.vmem %s785_s1, %s461_s30 }
  0x1a   : > { %v246_v0 = vld [vmem:[%s238_s7] sm:$0xf]  ;;  %s460_s30 = sshll.u32 %s229_s29, 3  ;;  %s552_s13 = sshll.u32 %s637_s18, 4  ;;  %s553_s13 = int_to_ptr.vmem [resolvable:$false] %s552_s13 }
  0x1b   : > { %249 = vrot.lane.b32.xlu0 %v246_v0, %s628_s11  ;;  %v247_v1 = vld [vmem:[%s245_s10] sm:$0xf]  ;;  %s231_s6 = scalar_lea.vmem [#allocation2], %s460_s30  ;;  %s737_s10 = scalar_lea.hbm %s788_s4, %s466_s5 }
  0x1c   : > { %s369_s7 = sshll.u32 %s231_s6, 4  ;;  %s355_s11 = scalar_lea.sflag [#allocation3], %s229_s29  ;;  %s739_s7 = int_to_ptr.vmem [resolvable:$true] %s369_s7 }
  0x1d   : > { %s554_s14 = scalar_lea.vmem %s553_s13, 256  ;;  %p555_p1 = scmp.lt.s32.totalorder %s739_s7, %s553_s13 }
  0x1f   : > { %253 = vrot.lane.b32.xlu0 %v247_v1, %s629_s12  ;;  %s548_s12 = scalar_lea.vmem %s739_s7, 128 }
  0x20   : > { %p549_p12 = scmp.ne.s32.totalorder %s739_s7, %s548_s12  ;;  %p556_p2 = scmp.lt.s32.totalorder %s554_s14, %s548_s12 }
  0x22   : > { %p550_p13 = pnand %p549_p12, %p703_p4  ;;  %p557_p3 = por %p556_p2, %p555_p1 }
  0x23   : > { %273 = vperm.xlu0 %547, %v270_v7  }
  0x24   : > { %p551_p0 = pneg %p550_p13 }
  0x26   : > { %p558_p5 = pnand %p557_p3, %p551_p0 }
  0x8d   : > { %v250_v2 = vpop.permute.xlu0 %249 }
  0x8e   : > { %v257_v5 = vsel %vm256_vm0, %v247_v1, %v250_v2 }
  0x91   : > { %v254_v6 = vpop.permute.xlu0 %253 }
  0x92   : > { %v259_v8 = vsel %vm258_vm1, %v257_v5, %v254_v6 }
  0x93   : > { %v261_v10 = vrot.slane %v259_v8, 4 }
  0x95   : > { %262 = vrot.lane.b32.xlu1 %v261_v10, %s634_s21 }
  0x99   : > { %265 = vrot.lane.b32.xlu1 %v259_v8, %s635_s22 }
  0xa2   : > { %v274_v16 = vpop.permute.xlu0 %273 }
 0x107   : > { %v263_v11 = vpop.permute.xlu1 %262 }
 0x108   : > { %v268_v12 = vsel %vm267_vm3, %v259_v8, %v263_v11 }
 0x10b   : > { %v266_v13 = vpop.permute.xlu1 %265 }
 0x10c   : > { %v480_v14 = vpack.c.bf16 %v266_v13, %v268_v12 }
 0x10e   : > { %482 = vmatpush3.bf16.msk.msra.mxu0 %vm481_vm5, %v480_v14 }
 0x111   : > { %477 = vmatmul.mubr.msk.f32.vlgmr.msra.gmra.mrb[0].mxu0 %vm276_vm6, %v269_v15 }
 0x1e4   : > { %v348_v17 = vpop.f32.mrb[0].mxu0 }
 0x1e5   : > { %v349_v18 = vadd.f32 %v348_v17, %v274_v16  ;;  %v478_v19 = vpop.f32.mrb[1].mxu0 }
 0x1e7   : > { %353 = vst.msk [vmem:[%s231_s6] sm:$0xff] %vm352_vm7, %v349_v18 }
 0x1e8   : > { %561 = shalt.err (!%p558_p5)
}
 0x1e9   : > { %s562_s21 = scalar_lea.hbm %s737_s10, 128  ;;  %s566_s26 = scalar_lea.hbm %s788_s4, 256 }
 0x1ea   : > { %p563_p6 = scmp.ne.s32.totalorder %s737_s10, %s562_s21  ;;  %p567_p10 = scmp.lt.u32.totalorder %s737_s10, %s788_s4 }
 0x1eb   : > { %p568_p11 = scmp.lt.u32.totalorder %s566_s26, %s562_s21  ;;  %p570_p13 = scmp.lt.u32.totalorder %s562_s21, %s737_s10 }
 0x1ec   : > { %p564_p7 = pnand %p563_p6, %p703_p4 }
 0x1ed   : > { %p569_p12 = por %p568_p11, %p567_p10 }
 0x1ee   : > { %p565_p9 = pneg %p564_p7 }
 0x1ef   : > { %p571_p0 = por %p570_p13, %p569_p12 }
 0x1f1   : > { %p572_p1 = pnand %p571_p0, %p565_p9 }
 0x1f3   : > { %575 = shalt.err (!%p572_p1)
}
 0x1f4   : > { %483 = dma.vmem_to_hbm [thread:$0]  (%p703_p4), %s739_s7, 128, %s737_s10, %s355_s11  }
 0x1f5 PF: > { %p489_p2 = scmp.ge.s32.totalorder %s626_s20, 2  ;;  %s381_s5 = sand.u32 1, %s606_s15  }
 0x1f6   : > { %s382_s6 = scalar_lea.sflag [#allocation3], %s381_s5 }
 0x1f7   : > { %p486_p3 = pnand %p489_p2, %p710_p8 }
 0x1f9   : > { %601 = dma.done.wait (!%p486_p3), %s382_s6, 128  }
 0x1fa   : > { %603 = vsyncadd (!%p486_p3), %s382_s6, 4294967168  ;;  %s17_s20 = sadd.s32 1, %s626_s20   ;;  %s791_s15 = smov %s610_s16 }
 0x1fb   : > { %p14_p5 = scmp.ge.s32.totalorder %s17_s20, 4   ;;  %s792_s16 = smov %s614_s17 }
 0x1fc   : > { %s793_s17 = smov %s716_s28  ;;  %s794_s18 = smov %s622_s19 }
 0x1fd   : > { %s795_s19 = smov %s797_s23  ;;  %16 = sbr.rel (!%p14_p5) target bundleno = 4 (0x4), region = 74 }
 0x204   :  { %387 = vsyncpa [#allocation3], 1 }
 0x205   :  { %389 = vsyncpa [#allocation3 + $0x1], 1 }

</bundles_post_ra>
